<compile_context>
chip_gen: v7x
topology: tpu7x:2x2x1
jax: 0.10.0
libtpu: 0.0.40
codegen_flags: <defaults>
</compile_context>

<pallas_src>
import numpy as np
import jax
import jax.numpy as jnp
from jax.experimental import pallas as pl
from jax.experimental.pallas import tpu as pltpu


# ---------------------------------------------------------------------------
# Kernel 1: RGCNConv layer, gridded over destination-row tiles.
#   out1[rows] = x[rows] @ root + sum_r a_rel[r, rows, :] @ (x @ W_r) + b1
# ---------------------------------------------------------------------------
def rgcn_kernel(x_ref, a_rel_ref, w_rel_cat_ref, root_ref, b1_ref, out1_ref):
    f32 = jnp.float32
    bf16 = jnp.bfloat16
    i = pl.program_id(0)
    tm = out1_ref.shape[0]
    h = root_ref.shape[1]
    num_rel = a_rel_ref.shape[0]

    x_full = x_ref[...]                                            # (N, F) bf16
    # Wide (R*H = 128-lane) stacked source transform in ONE MXU dot.
    # NOTE: recomputed per row tile (cheap relative to the adjacency matmuls);
    # for very large N hoist this into its own row-tiled pallas_call.
    xw_rel = jnp.dot(x_full, w_rel_cat_ref[...],
                     preferred_element_type=f32)                   # (N, R*H) f32
    xw_rel = xw_rel.astype(bf16)

    row0 = pl.multiple_of(i * tm, tm)
    x_rows = x_ref[pl.ds(row0, tm), :]                             # (tm, F) bf16
    out1 = jnp.dot(x_rows, root_ref[...], preferred_element_type=f32)

    for r in range(num_rel):                                       # static, small R
        out1 = out1 + jnp.dot(a_rel_ref[r], xw_rel[:, r * h:(r + 1) * h],
                              preferred_element_type=f32)
    out1_ref[...] = out1 + b1_ref[...]                             # bias in f32


# ---------------------------------------------------------------------------
# Kernel 2: GraphConv layer + classification head, gridded over dest-row tiles.
#   out2[rows] = (adj[rows,:] @ out1) @ w2 + out1[rows] @ lin2_w + lin2_b
#   hidden     = relu(x[rows] @ lin3_xw + out2 @ lin3_ow + lin3_b)   # fused concat
#   log_prob   = log_softmax(hidden @ smax_w + smax_b)               # C padded to 128
# ---------------------------------------------------------------------------
def gconv_head_kernel(x_ref, out1_full_ref, adj_ref, w2_ref, lin2_w_ref, lin2_b_ref,
                      lin3_xw_ref, lin3_ow_ref, lin3_b_ref, smax_w_ref, smax_b_ref,
                      o_ref):
    f32 = jnp.float32
    bf16 = jnp.bfloat16
    i = pl.program_id(0)
    tm = o_ref.shape[0]

    x_rows = x_ref[...]                                            # (tm, F) bf16
    out1_full = out1_full_ref[...].astype(bf16)                    # (N, H)
    row0 = pl.multiple_of(i * tm, tm)
    out1_rows = out1_full_ref[pl.ds(row0, tm), :].astype(bf16)     # (tm, H)

    # GraphConv (aggregate-then-transform: adj @ (out1 @ w2) == (adj @ out1) @ w2).
    agg = jnp.dot(adj_ref[...], out1_full, preferred_element_type=f32)          # (tm, H)
    out2 = (jnp.dot(agg.astype(bf16), w2_ref[...], preferred_element_type=f32)
            + jnp.dot(out1_rows, lin2_w_ref[...], preferred_element_type=f32)
            + lin2_b_ref[...])

    # classify_node_features: concat([x, out2]) fused by splitting the Linear weight.
    hidden = (jnp.dot(x_rows, lin3_xw_ref[...], preferred_element_type=f32)
              + jnp.dot(out2.astype(bf16), lin3_ow_ref[...], preferred_element_type=f32)
              + lin3_b_ref[...])
    hidden = jnp.maximum(hidden, 0.0)
    # TODO(synk): nn.Dropout(0.5) treated as eval-mode identity (no RNG masking).
    logits = (jnp.dot(hidden.astype(bf16), smax_w_ref[...], preferred_element_type=f32)
              + smax_b_ref[...])                                   # (tm, 128); pads = -1e9

    # log_softmax over the (padded) class dimension; pad columns contribute exp(-1e9)=0.
    m = jnp.max(logits, axis=1, keepdims=True)
    lse = jnp.log(jnp.sum(jnp.exp(logits - m), axis=1, keepdims=True)) + m
    o_ref[...] = logits - lse


# ---------------------------------------------------------------------------
# Wrapper: host-side weight stacking / bf16 casts / class padding + two
# pallas_calls gridded over destination-row tiles.
# ---------------------------------------------------------------------------
def graphnet_forward(x, a_rel, w_rel, root, b1, adj, w2, lin2_w, lin2_b,
                     lin3_xw, lin3_ow, lin3_b, smax_w, smax_b, *, row_tile=128):
    f32 = jnp.float32
    bf16 = jnp.bfloat16

    n, f = x.shape
    r, _, h = w_rel.shape
    c = smax_w.shape[1]
    c_pad = ((c + 127) // 128) * 128          # lane-dense output (multiple of 128)

    tm = min(row_tile, n)
    assert n % tm == 0, "demo restriction: num_nodes must be a multiple of the row tile"
    n_tiles = n // tm

    # --- host-side operand prep (bf16 matmul operands, stacked weights, padded head)
    x_bf = x.astype(bf16)
    a_rel_bf = a_rel.astype(bf16)
    adj_bf = adj.astype(bf16)
    # [W_0 | W_1 | ... | W_{R-1}]  ->  (F, R*H) == 128 lanes for R=4, H=32
    w_rel_cat = jnp.transpose(w_rel, (1, 0, 2)).reshape(f, r * h).astype(bf16)
    root_bf = root.astype(bf16)
    w2_bf = w2.astype(bf16)
    lin2_w_bf = lin2_w.astype(bf16)
    lin3_xw_bf = lin3_xw.astype(bf16)
    lin3_ow_bf = lin3_ow.astype(bf16)
    smax_w_pad = jnp.zeros((h, c_pad), f32).at[:, :c].set(smax_w).astype(bf16)
    smax_b_pad = jnp.full((1, c_pad), -1e9, f32).at[:, :c].set(smax_b)

    cparams = pltpu.CompilerParams(
        dimension_semantics=("parallel",),
        vmem_limit_bytes=32 * 1024 * 1024,
    )

    # --- layer 1: RGCNConv -------------------------------------------------
    out1 = pl.pallas_call(
        rgcn_kernel,
        out_shape=jax.ShapeDtypeStruct((n, h), f32),
        grid_spec=pltpu.PrefetchScalarGridSpec(
            num_scalar_prefetch=0,
            grid=(n_tiles,),
            in_specs=[
                pl.BlockSpec((n, f), lambda i: (0, 0)),           # x (full, stays resident)
                pl.BlockSpec((r, tm, n), lambda i: (0, i, 0)),    # a_rel row tile (streamed)
                pl.BlockSpec((f, r * h), lambda i: (0, 0)),       # stacked relation weights
                pl.BlockSpec((f, h), lambda i: (0, 0)),           # root
                pl.BlockSpec((1, h), lambda i: (0, 0)),           # bias
            ],
            out_specs=pl.BlockSpec((tm, h), lambda i: (i, 0)),
        ),
        compiler_params=cparams,
    )(x_bf, a_rel_bf, w_rel_cat, root_bf, b1)

    # --- layer 2 + classification head --------------------------------------
    log_prob_pad = pl.pallas_call(
        gconv_head_kernel,
        out_shape=jax.ShapeDtypeStruct((n, c_pad), f32),
        grid_spec=pltpu.PrefetchScalarGridSpec(
            num_scalar_prefetch=0,
            grid=(n_tiles,),
            in_specs=[
                pl.BlockSpec((tm, f), lambda i: (i, 0)),          # x row tile
                pl.BlockSpec((n, h), lambda i: (0, 0)),           # out1 (full, resident)
                pl.BlockSpec((tm, n), lambda i: (i, 0)),          # adj row tile (streamed)
                pl.BlockSpec((h, h), lambda i: (0, 0)),           # w2
                pl.BlockSpec((h, h), lambda i: (0, 0)),           # lin2_w
                pl.BlockSpec((1, h), lambda i: (0, 0)),           # lin2_b
                pl.BlockSpec((f, h), lambda i: (0, 0)),           # lin3_xw
                pl.BlockSpec((h, h), lambda i: (0, 0)),           # lin3_ow
                pl.BlockSpec((1, h), lambda i: (0, 0)),           # lin3_b
                pl.BlockSpec((h, c_pad), lambda i: (0, 0)),       # smax_w (lane-padded)
                pl.BlockSpec((1, c_pad), lambda i: (0, 0)),       # smax_b (pads = -1e9)
            ],
            out_specs=pl.BlockSpec((tm, c_pad), lambda i: (i, 0)),
        ),
        compiler_params=cparams,
    )(x_bf, out1, adj_bf, w2_bf, lin2_w_bf, lin2_b,
      lin3_xw_bf, lin3_ow_bf, lin3_b, smax_w_pad, smax_b_pad)

    return log_prob_pad[:, :c]                 # strip lane padding


# ---------------------------------------------------------------------------
# Pure-JAX f32 reference (same math as the PyTorch module) for the check.
# ---------------------------------------------------------------------------
def graphnet_reference(x, a_rel, w_rel, root, b1, adj, w2, lin2_w, lin2_b,
                       lin3_xw, lin3_ow, lin3_b, smax_w, smax_b):
    out1 = x @ root
    for r in range(a_rel.shape[0]):
        out1 = out1 + a_rel[r] @ (x @ w_rel[r])
    out1 = out1 + b1
    out2 = adj @ (out1 @ w2) + out1 @ lin2_w + lin2_b
    hidden = jnp.maximum(x @ lin3_xw + out2 @ lin3_ow + lin3_b, 0.0)
    logits = hidden @ smax_w + smax_b
    return jax.nn.log_softmax(logits, axis=1)


if __name__ == "__main__":
    # ---- small, module-consistent sizes -------------------------------------
    N = 16            # num graph nodes
    F = 32            # num_features
    H = 32            # hidden_size
    R = 4             # num_relations
    C = 8             # num_classes
    NB = 30           # num_bases (RGCNConv)
    E = 40            # num edges

    key = jax.random.PRNGKey(0)
    keys = jax.random.split(key, 16)

    # ---- deterministic synthetic inputs (graph) -----------------------------
    x = jax.random.normal(keys[0], (N, F), dtype=jnp.float32)
    src = jax.random.randint(keys[1], (E,), 0, N)
    dst = jax.random.randint(keys[2], (E,), 0, N)
    edge_index = jnp.stack([src, dst])                      # (2, E), PyG layout
    edge_type = jax.random.randint(keys[3], (E,), 0, R)
    edge_norm = jax.random.uniform(keys[4], (E,), dtype=jnp.float32)

    # ---- deterministic parameters (shapes from GraphNet.__init__) -----------
    s = 0.1
    basis   = s * jax.random.normal(keys[5], (NB, F, H), dtype=jnp.float32)   # RGCNConv.basis
    att     = s * jax.random.normal(keys[6], (R, NB), dtype=jnp.float32)      # RGCNConv.att
    root    = s * jax.random.normal(keys[7], (F, H), dtype=jnp.float32)       # RGCNConv.root
    b1      = s * jax.random.normal(keys[8], (1, H), dtype=jnp.float32)       # RGCNConv.bias
    w2      = s * jax.random.normal(keys[9], (H, H), dtype=jnp.float32)       # GraphConv.weight
    lin2_w  = s * jax.random.normal(keys[10], (H, H), dtype=jnp.float32)      # GraphConv.lin.weight^T
    lin2_b  = s * jax.random.normal(keys[11], (1, H), dtype=jnp.float32)      # GraphConv.lin.bias
    lin3_w  = s * jax.random.normal(keys[12], (F + H, H), dtype=jnp.float32)  # self.linear.weight^T
    lin3_b  = s * jax.random.normal(keys[13], (1, H), dtype=jnp.float32)      # self.linear.bias
    smax_w  = s * jax.random.normal(keys[14], (H, C), dtype=jnp.float32)      # softmax_fc.weight^T
    smax_b  = s * jax.random.normal(keys[15], (1, C), dtype=jnp.float32)      # softmax_fc.bias

    # RGCN basis decomposition (tiny; done in glue): W_r = sum_b att[r,b] * basis[b]
    w_rel = (att @ basis.reshape(NB, F * H)).reshape(R, F, H)

    # Split the post-concat Linear into the x-part and the out-part of the weight.
    lin3_xw = lin3_w[:F]        # (F, H)
    lin3_ow = lin3_w[F:]        # (H, H)

    # Densify edge lists into (dst, src) adjacency operators (glue, scatter-add).
    a_rel = jnp.zeros((R, N, N), jnp.float32).at[edge_type, dst, src].add(edge_norm)
    adj = jnp.zeros((N, N), jnp.float32).at[dst, src].add(1.0)

    # ---- run the Pallas kernels ---------------------------------------------
    args = (x, a_rel, w_rel, root, b1, adj, w2, lin2_w, lin2_b,
            lin3_xw, lin3_ow, lin3_b, smax_w, smax_b)
    log_prob = graphnet_forward(*args)
    log_prob = jax.block_until_ready(log_prob)

    # ---- check against pure-JAX f32 reference --------------------------------
    # Tolerance is loose because the kernel intentionally runs all matmuls with
    # bf16 operands (f32 accumulation) for native-rate MXU; keep operands in f32
    # if exact parity with the f32 reference is required.
    ref = jax.block_until_ready(graphnet_reference(*args))
    np.testing.assert_allclose(np.asarray(log_prob), np.asarray(ref),
                               rtol=5e-2, atol=5e-2)
    assert log_prob.shape == (N, C)

    print("KERNEL_OK")
</pallas_src>

<mosaic_0001>
module attributes {stable_mosaic.version = 11 : i64} {
  func.func @rgcn_kernel(%arg0: i32, %arg1: memref<16x32xbf16, #tpu.memory_space<vmem>>, %arg2: memref<4x16x16xbf16, #tpu.memory_space<vmem>>, %arg3: memref<32x128xbf16, #tpu.memory_space<vmem>>, %arg4: memref<32x32xbf16, #tpu.memory_space<vmem>>, %arg5: memref<1x32xf32, #tpu.memory_space<vmem>>, %arg6: memref<16x32xf32, #tpu.memory_space<vmem>>) attributes {dimension_semantics = [#tpu.dimension_semantics<parallel>], iteration_bounds = array<i64: 1>, scalar_prefetch = 0 : i64, scratch_operands = 0 : i64, tpu.core_type = #tpu.core_type<tc>, window_params = [{pipeline_mode = #tpu.pipeline_mode<synchronous>, transform_indices = @transform_0, window_bounds = array<i64: 16, 32>}, {transform_indices = @transform_1, window_bounds = array<i64: 4, 16, 16>}, {pipeline_mode = #tpu.pipeline_mode<synchronous>, transform_indices = @transform_2, window_bounds = array<i64: 32, 128>}, {pipeline_mode = #tpu.pipeline_mode<synchronous>, transform_indices = @transform_3, window_bounds = array<i64: 32, 32>}, {pipeline_mode = #tpu.pipeline_mode<synchronous>, transform_indices = @transform_4, window_bounds = array<i64: 1, 32>}, {transform_indices = @transform_5, window_bounds = array<i64: 16, 32>}]} {
    %c0 = arith.constant 0 : index
    %c0_0 = arith.constant 0 : index
    %0 = vector.load %arg1[%c0, %c0_0] : memref<16x32xbf16, #tpu.memory_space<vmem>>, vector<16x32xbf16>
    %c0_1 = arith.constant 0 : index
    %c0_2 = arith.constant 0 : index
    %1 = vector.load %arg3[%c0_1, %c0_2] : memref<32x128xbf16, #tpu.memory_space<vmem>>, vector<32x128xbf16>
    %cst = arith.constant dense<0.000000e+00> : vector<16x128xf32>
    %2 = tpu.matmul %0, %1, %cst {dimension_numbers = #tpu.dot_dimension_numbers<[1], [0], [0], [1], [0, 0, 1, 1], [], []>} : vector<16x32xbf16>, vector<32x128xbf16>, vector<16x128xf32> -> vector<16x128xf32>
    %3 = arith.truncf %2 : vector<16x128xf32> to vector<16x128xbf16>
    %c16_i32 = arith.constant 16 : i32
    %4 = arith.muli %arg0, %c16_i32 : i32
    %5 = tpu.assume_multiple %4, 16 : i32
    %6 = arith.index_cast %5 : i32 to index
    %c0_3 = arith.constant 0 : index
    %7 = vector.load %arg1[%6, %c0_3] : memref<16x32xbf16, #tpu.memory_space<vmem>>, vector<16x32xbf16>
    %c0_4 = arith.constant 0 : index
    %c0_5 = arith.constant 0 : index
    %8 = vector.load %arg4[%c0_4, %c0_5] : memref<32x32xbf16, #tpu.memory_space<vmem>>, vector<32x32xbf16>
    %cst_6 = arith.constant dense<0.000000e+00> : vector<16x32xf32>
    %9 = tpu.matmul %7, %8, %cst_6 {dimension_numbers = #tpu.dot_dimension_numbers<[1], [0], [0], [1], [0, 0, 1, 1], [], []>} : vector<16x32xbf16>, vector<32x32xbf16>, vector<16x32xf32> -> vector<16x32xf32>
    %c0_7 = arith.constant 0 : index
    %c0_8 = arith.constant 0 : index
    %c0_9 = arith.constant 0 : index
    %10 = vector.load %arg2[%c0_7, %c0_8, %c0_9] : memref<4x16x16xbf16, #tpu.memory_space<vmem>>, vector<1x16x16xbf16>
    %11 = vector.shape_cast %10 : vector<1x16x16xbf16> to vector<16x16xbf16>
    %12 = vector.extract_strided_slice %3 {offsets = [0, 0], sizes = [16, 32], strides = [1, 1]} : vector<16x128xbf16> to vector<16x32xbf16>
    %cst_10 = arith.constant dense<0.000000e+00> : vector<16x32xf32>
    %13 = tpu.matmul %11, %12, %cst_10 {dimension_numbers = #tpu.dot_dimension_numbers<[1], [0], [0], [1], [0, 0, 1, 1], [], []>} : vector<16x16xbf16>, vector<16x32xbf16>, vector<16x32xf32> -> vector<16x32xf32>
    %14 = arith.addf %9, %13 : vector<16x32xf32>
    %c1 = arith.constant 1 : index
    %c0_11 = arith.constant 0 : index
    %c0_12 = arith.constant 0 : index
    %15 = vector.load %arg2[%c1, %c0_11, %c0_12] : memref<4x16x16xbf16, #tpu.memory_space<vmem>>, vector<1x16x16xbf16>
    %16 = vector.shape_cast %15 : vector<1x16x16xbf16> to vector<16x16xbf16>
    %17 = vector.extract_strided_slice %3 {offsets = [0, 32], sizes = [16, 32], strides = [1, 1]} : vector<16x128xbf16> to vector<16x32xbf16>
    %cst_13 = arith.constant dense<0.000000e+00> : vector<16x32xf32>
    %18 = tpu.matmul %16, %17, %cst_13 {dimension_numbers = #tpu.dot_dimension_numbers<[1], [0], [0], [1], [0, 0, 1, 1], [], []>} : vector<16x16xbf16>, vector<16x32xbf16>, vector<16x32xf32> -> vector<16x32xf32>
    %19 = arith.addf %14, %18 : vector<16x32xf32>
    %c2 = arith.constant 2 : index
    %c0_14 = arith.constant 0 : index
    %c0_15 = arith.constant 0 : index
    %20 = vector.load %arg2[%c2, %c0_14, %c0_15] : memref<4x16x16xbf16, #tpu.memory_space<vmem>>, vector<1x16x16xbf16>
    %21 = vector.shape_cast %20 : vector<1x16x16xbf16> to vector<16x16xbf16>
    %22 = vector.extract_strided_slice %3 {offsets = [0, 64], sizes = [16, 32], strides = [1, 1]} : vector<16x128xbf16> to vector<16x32xbf16>
    %cst_16 = arith.constant dense<0.000000e+00> : vector<16x32xf32>
    %23 = tpu.matmul %21, %22, %cst_16 {dimension_numbers = #tpu.dot_dimension_numbers<[1], [0], [0], [1], [0, 0, 1, 1], [], []>} : vector<16x16xbf16>, vector<16x32xbf16>, vector<16x32xf32> -> vector<16x32xf32>
    %24 = arith.addf %19, %23 : vector<16x32xf32>
    %c3 = arith.constant 3 : index
    %c0_17 = arith.constant 0 : index
    %c0_18 = arith.constant 0 : index
    %25 = vector.load %arg2[%c3, %c0_17, %c0_18] : memref<4x16x16xbf16, #tpu.memory_space<vmem>>, vector<1x16x16xbf16>
    %26 = vector.shape_cast %25 : vector<1x16x16xbf16> to vector<16x16xbf16>
    %27 = vector.extract_strided_slice %3 {offsets = [0, 96], sizes = [16, 32], strides = [1, 1]} : vector<16x128xbf16> to vector<16x32xbf16>
    %cst_19 = arith.constant dense<0.000000e+00> : vector<16x32xf32>
    %28 = tpu.matmul %26, %27, %cst_19 {dimension_numbers = #tpu.dot_dimension_numbers<[1], [0], [0], [1], [0, 0, 1, 1], [], []>} : vector<16x16xbf16>, vector<16x32xbf16>, vector<16x32xf32> -> vector<16x32xf32>
    %29 = arith.addf %24, %28 : vector<16x32xf32>
    %c0_20 = arith.constant 0 : index
    %c0_21 = arith.constant 0 : index
    %30 = vector.load %arg5[%c0_20, %c0_21] : memref<1x32xf32, #tpu.memory_space<vmem>>, vector<1x32xf32>
    %31 = vector.broadcast %30 : vector<1x32xf32> to vector<16x32xf32>
    %32 = arith.addf %29, %31 : vector<16x32xf32>
    %c0_22 = arith.constant 0 : index
    %c0_23 = arith.constant 0 : index
    %33 = vector.load %arg6[%c0_22, %c0_23] : memref<16x32xf32, #tpu.memory_space<vmem>>, vector<16x32xf32>
    tpu.vector_store %arg6[%c0_22, %c0_23], %32 {strides = array<i32>} : memref<16x32xf32, #tpu.memory_space<vmem>>, vector<16x32xf32>,
    return
  }
  func.func @transform_0(%arg0: i32) -> (i32, i32) {
    %c0_i32 = arith.constant 0 : i32
    %c0_i32_0 = arith.constant 0 : i32
    %c0_i32_1 = arith.constant 0 : i32
    return %c0_i32, %c0_i32_0 : i32, i32
  }
  func.func @transform_1(%arg0: i32) -> (i32, i32, i32) {
    %c0_i32 = arith.constant 0 : i32
    %c0_i32_0 = arith.constant 0 : i32
    %c0_i32_1 = arith.constant 0 : i32
    return %c0_i32, %arg0, %c0_i32_0 : i32, i32, i32
  }
  func.func @transform_2(%arg0: i32) -> (i32, i32) {
    %c0_i32 = arith.constant 0 : i32
    %c0_i32_0 = arith.constant 0 : i32
    %c0_i32_1 = arith.constant 0 : i32
    return %c0_i32, %c0_i32_0 : i32, i32
  }
  func.func @transform_3(%arg0: i32) -> (i32, i32) {
    %c0_i32 = arith.constant 0 : i32
    %c0_i32_0 = arith.constant 0 : i32
    %c0_i32_1 = arith.constant 0 : i32
    return %c0_i32, %c0_i32_0 : i32, i32
  }
  func.func @transform_4(%arg0: i32) -> (i32, i32) {
    %c0_i32 = arith.constant 0 : i32
    %c0_i32_0 = arith.constant 0 : i32
    %c0_i32_1 = arith.constant 0 : i32
    return %c0_i32, %c0_i32_0 : i32, i32
  }
  func.func @transform_5(%arg0: i32) -> (i32, i32) {
    %c0_i32 = arith.constant 0 : i32
    %c0_i32_0 = arith.constant 0 : i32
    return %arg0, %c0_i32 : i32, i32
  }
}

</mosaic_0001>

<bundles_post_ra>
// kernel: tpu_custom_call.1
= control target key start
LH: loop header
LB: loop body
LE: loop exit
PB: predicated region body
PF: predicated region fallthrough
CT: control target
= control target key end

     0   :  { %10 = vsyncpa [#allocation3], 0  ;;  %s833_s0 = inlined_call_operand.hbm [shape: bf16[16,32], index: 0, kind: input, shape index: {}]   ;;  %s834_s1 = inlined_call_operand.hbm [shape: bf16[4,16,16], index: 1, kind: input, shape index: {}]   ;;  %s835_s2 = inlined_call_operand.hbm [shape: bf16[32,128], index: 2, kind: input, shape index: {}]   ;;  %s836_s3 = inlined_call_operand.hbm [shape: bf16[32,32], index: 3, kind: input, shape index: {}]   ;;  %s837_s4 = inlined_call_operand.vmem [shape: f32[1,32], index: 4, kind: input, shape index: {}]   ;;  %s838_s5 = inlined_call_operand.hbm [shape: f32[16,32], index: 5, kind: output, shape index: {}]  }
   0x1   :  { %11 = vsyncpa [#allocation6], 0 }
   0x2   :  { %12 = vsyncpa [#allocation9], 0 }
   0x3   :  { %13 = vsyncpa [#allocation4], 0  ;;  %s686_s18 = smov [#allocation5]   ;;  %s687_s20 = smov [#allocation2]  }
   0x4   :  { %s31_s19 = sshll.u32 %s686_s18, 4  ;;  %s19_s21 = sshll.u32 %s687_s20, 4  ;;  %s32_s19 = int_to_ptr.vmem [resolvable:$true] %s31_s19  ;;  %s729_s21 = int_to_ptr.vmem [resolvable:$true] %s19_s21 }
   0x5   :  { %s568_s24 = scalar_lea.hbm %s834_s1, 512 }
   0x6   :  { %p569_p0 = scmp.ne.s32.totalorder %s834_s1, %s568_s24  ;;  %p572_p1 = scmp.lt.u32.totalorder %s568_s24, %s834_s1 }
   0x8   :  { %p574_p2 = pnand %p572_p1, %p569_p0 }
   0xa   :  { %577 = shalt.err (!%p574_p2)
}
   0xb   :  { %s578_s29 = scalar_lea.vmem %s32_s19, 512  ;;  %p583_p4 = scmp.lt.s32.totalorder %s32_s19, %s32_s19 }
   0xc   :  { %p579_p3 = scmp.ne.s32.totalorder %s32_s19, %s578_s29  ;;  %p584_p5 = scmp.lt.s32.totalorder %s578_s29, %s578_s29 }
   0xe   :  { %p585_p6 = por %p584_p5, %p583_p4 }
  0x10   :  { %p586_p7 = pnand %p585_p6, %p579_p3 }
  0x12   :  { %589 = shalt.err (!%p586_p7)
}
  0x13   :  { %s688_s30 = smov 64   ;;  %s689_s6 = smov 4  }
  0x14   :  { %37 = dma.hbm_to_vmem [thread:$0]  %s834_s1, 512, %s32_s19, [#allocation6], %s688_s30, %s688_s30, %s689_s6  }
  0x15   :  { %s590_s11 = scalar_lea.hbm %s833_s0, 128 }
  0x16   :  { %p591_p8 = scmp.ne.s32.totalorder %s833_s0, %s590_s11  ;;  %p594_p9 = scmp.lt.u32.totalorder %s590_s11, %s833_s0 }
  0x18   :  { %p596_p10 = pnand %p594_p9, %p591_p8 }
  0x1a   :  { %599 = shalt.err (!%p596_p10)
}
  0x1b   :  { %s600_s16 = scalar_lea.vmem %s729_s21, 128  ;;  %p605_p12 = scmp.lt.s32.totalorder %s729_s21, %s729_s21 }
  0x1c   :  { %p601_p11 = scmp.ne.s32.totalorder %s729_s21, %s600_s16  ;;  %p606_p13 = scmp.lt.s32.totalorder %s600_s16, %s600_s16 }
  0x1e   :  { %p607_p0 = por %p606_p13, %p605_p12 }
  0x20   :  { %p608_p1 = pnand %p607_p0, %p601_p11 }
  0x22   :  { %611 = shalt.err (!%p608_p1)
}
  0x23   :  { %25 = dma.hbm_to_vmem [thread:$0]  %s833_s0, 128, %s729_s21, [#allocation3], %s688_s30, %s688_s30, %s689_s6  }
  0x24   :  { %s690_s18 = smov [#allocation7]   ;;  %s691_s20 = smov [#allocation8]  }
  0x25   :  { %s43_s19 = sshll.u32 %s690_s18, 4  ;;  %s55_s22 = sshll.u32 %s691_s20, 4  ;;  %s44_s19 = int_to_ptr.vmem [resolvable:$true] %s43_s19  ;;  %s766_s22 = int_to_ptr.vmem [resolvable:$true] %s55_s22 }
  0x26   :  { %s612_s25 = scalar_lea.hbm %s835_s2, 256 }
  0x27   :  { %p613_p2 = scmp.ne.s32.totalorder %s835_s2, %s612_s25  ;;  %p616_p3 = scmp.lt.u32.totalorder %s612_s25, %s835_s2 }
  0x29   :  { %p618_p4 = pnand %p616_p3, %p613_p2 }
  0x2b   :  { %621 = shalt.err (!%p618_p4)
}
  0x2c   :  { %s622_s0 = scalar_lea.vmem %s44_s19, 256  ;;  %p627_p6 = scmp.lt.s32.totalorder %s44_s19, %s44_s19 }
  0x2d   :  { %p623_p5 = scmp.ne.s32.totalorder %s44_s19, %s622_s0  ;;  %p628_p7 = scmp.lt.s32.totalorder %s622_s0, %s622_s0 }
  0x2f   :  { %p629_p8 = por %p628_p7, %p627_p6 }
  0x31   :  { %p630_p9 = pnand %p629_p8, %p623_p5 }
  0x33   :  { %633 = shalt.err (!%p630_p9)
}
  0x34   :  { %49 = dma.hbm_to_vmem [thread:$0]  %s835_s2, 256, %s44_s19, [#allocation6], %s688_s30, %s688_s30, %s689_s6  }
  0x35   :  { %s634_s10 = scalar_lea.hbm %s836_s3, 256 }
  0x36   :  { %p635_p10 = scmp.ne.s32.totalorder %s836_s3, %s634_s10  ;;  %p638_p11 = scmp.lt.u32.totalorder %s634_s10, %s836_s3 }
  0x38   :  { %p640_p12 = pnand %p638_p11, %p635_p10 }
  0x3a   :  { %643 = shalt.err (!%p640_p12)
}
  0x3b   :  { %s644_s15 = scalar_lea.vmem %s766_s22, 256  ;;  %p649_p0 = scmp.lt.s32.totalorder %s766_s22, %s766_s22 }
  0x3c   :  { %p645_p13 = scmp.ne.s32.totalorder %s766_s22, %s644_s15  ;;  %p650_p1 = scmp.lt.s32.totalorder %s644_s15, %s644_s15 }
  0x3e   :  { %p651_p2 = por %p650_p1, %p649_p0 }
  0x40   :  { %p652_p3 = pnand %p651_p2, %p645_p13 }
  0x42   :  { %655 = shalt.err (!%p652_p3)
}
  0x43   :  { %61 = dma.hbm_to_vmem [thread:$0]  %s836_s3, 256, %s766_s22, [#allocation9], %s688_s30, %s688_s30, %s689_s6  }
  0x44   :  { %678 = dma.done.wait [#allocation3], 128  }
  0x45   :  { %679 = vsyncadd [#allocation3], 4294967168 }
  0x46   :  { %680 = dma.done.wait [#allocation6], 768  }
  0x47   :  { %681 = vsyncadd [#allocation6], 4294966528 }
  0x48   :  { %682 = dma.done.wait [#allocation9], 256  }
  0x49   :  { %683 = vsyncadd [#allocation9], 4294967040  ;;  %v692_v0 = vmov 0.0   ;;  %vm693_vm0 = vmmov 0   ;;  %v558_v1 = vld [vmem:[#allocation7] sm:$0xff]   ;;  %v559_v2 = vld [vmem:[#allocation7 + $0x8] sm:$0xff]  }
  0x4a   :  { %505 = vmatprep.subr.bf16.mxu0 %v692_v0  ;;  %509 = vmatprep.mubr.msk.bf16.mxu0 %vm693_vm0, %v692_v0  ;;  %vm100_vm1 = vcmask 261120   ;;  %v560_v3 = vld [vmem:[#allocation2] sm:$0xff]   ;;  %s694_s3 = smov 32   ;;  %s695_s6 = smov 96   ;;  %v561_v9 = vld [vmem:[#allocation5] sm:$0xff]   ;;  %vm164_vm2 = vcmask 130048  }
  0x4b   :  { %513 = vmatprep.subr.bf16.mxu1 %v692_v0  ;;  %515 = vmatprep.mubr.msk.bf16.mxu1 %vm693_vm0, %v692_v0  ;;  %v562_v10 = vld [vmem:[#allocation8] sm:$0xff]   ;;  %v563_v11 = vld [vmem:[#allocation8 + $0x8] sm:$0xff]   ;;  %v565_v14 = vld [vmem:[#allocation5 + $0x8] sm:$0xff]   ;;  %s696_s17 = smov [#allocation10]  }
  0x4c   :  { %506 = vmatpush3.bf16.msra.mxu0 %v558_v1  ;;  %v564_v12 = vld [vmem:[#allocation2] sm:$0xff]   ;;  %v566_v17 = vld [vmem:[#allocation5 + $0x10] sm:$0xff]   ;;  %s458_s18 = sshll.u32 %s696_s17, 4  ;;  %s459_s18 = int_to_ptr.vmem [resolvable:$true] %s458_s18 }
  0x4d   :  { %507 = vmatprep.subr.bf16.mxu0 %v692_v0  ;;  %v567_v18 = vld [vmem:[#allocation5 + $0x18] sm:$0xff]   ;;  %s656_s19 = scalar_lea.vmem %s459_s18, 256  ;;  %p661_p5 = scmp.lt.s32.totalorder %s459_s18, %s459_s18 }
  0x4e   :  { %v490_v42 = vld [vmem:[%s837_s4] ss:$0 sm:$0xff]  ;;  %p657_p4 = scmp.ne.s32.totalorder %s459_s18, %s656_s19  ;;  %p662_p6 = scmp.lt.s32.totalorder %s656_s19, %s656_s19 }
  0x50   :  { %508 = vmatpush3.bf16.msra.mxu0 %v559_v2  ;;  %p663_p7 = por %p662_p6, %p661_p5 }
  0x51   :  { %527 = vmatprep.subr.bf16.mxu0 %v692_v0 }
  0x52   :  { %p664_p8 = pnand %p663_p7, %p657_p4 }
  0x53   :  { %510 = vmatmul.mubr.msk.bf16.vlgmr.msra.gmra.mrb[0].mxu0 %vm100_vm1, %v560_v3 }
  0x54   :  { %529 = vmatprep.mubr.msk.bf16.mxu0 %vm693_vm0, %v692_v0 }
 0x126   :  { %v138_v4 = vpop.f32.mrb[0].mxu0 }
 0x127   :  { %v511_v5 = vpop.f32.mrb[1].mxu0 }
 0x128   :  { %v141_v6 = vpop.f32.mrb[2].mxu0 }
 0x129   :  { %v145_v7 = vpack.c.bf16 %v141_v6, %v138_v4  ;;  %v512_v8 = vpop.f32.mrb[3].mxu0 }
 0x12b   :  { %393 = vrot.lane.b32.xlu1 %v145_v7, %s694_s3  ;;  %279 = vrot.lane.b32.xlu0 %v145_v7, %s695_s6 }
 0x12c   :  { %514 = vmatpush3.bf16.msra.mxu1 %v145_v7 }
 0x12d   :  { %519 = vmatprep.subr.bf16.mxu1 %v692_v0 }
 0x12f   :  { %336 = vrot.lane.b32.xlu0 %v145_v7, %s688_s30  ;;  %516 = vmatmul.mubr.msk.bf16.vlgmr.msra.gmra.mrb[0].mxu1 %vm164_vm2, %v561_v9 }
 0x130   :  { %520 = vmatpush3.bf16.msra.mxu1 %v562_v10  ;;  %523 = vmatprep.mubr.msk.bf16.mxu1 %vm693_vm0, %v692_v0 }
 0x131   :  { %521 = vmatprep.subr.bf16.mxu1 %v692_v0 }
 0x134   :  { %522 = vmatpush3.bf16.msra.mxu1 %v563_v11 }
 0x135   :  { %533 = vmatprep.subr.bf16.mxu1 %v692_v0 }
 0x137   :  { %524 = vmatmul.mubr.msk.bf16.vlgmr.msra.gmra.mrb[4].mxu1 %vm100_vm1, %v564_v12 }
 0x138   :  { %535 = vmatprep.mubr.msk.bf16.mxu1 %vm693_vm0, %v692_v0 }
 0x19d   :  { %v280_v13 = vpop.permute.xlu0 %279  ;;  %v394_v15 = vpop.permute.xlu1 %393 }
 0x19e   :  { %528 = vmatpush3.bf16.msra.mxu0 %v280_v13 }
 0x19f   :  { %539 = vmatprep.subr.bf16.mxu0 %v692_v0 }
 0x1a1   :  { %530 = vmatmul.mubr.msk.bf16.vlgmr.msra.gmra.mrb[4].mxu0 %vm164_vm2, %v565_v14  ;;  %v337_v16 = vpop.permute.xlu0 %336 }
 0x1a2   :  { %534 = vmatpush3.bf16.msra.mxu1 %v337_v16  ;;  %540 = vmatpush3.bf16.msra.mxu0 %v394_v15 }
 0x1a3   :  { %541 = vmatprep.mubr.msk.bf16.mxu0 %vm693_vm0, %v692_v0 }
 0x1a5   :  { %536 = vmatmul.mubr.msk.bf16.vlgmr.msra.gmra.mrb[8].mxu1 %vm164_vm2, %v566_v17 }
 0x1a9   :  { %542 = vmatmul.mubr.msk.bf16.vlgmr.msra.gmra.mrb[8].mxu0 %vm164_vm2, %v567_v18 }
 0x202   :  { %v202_v19 = vpop.f32.mrb[0].mxu1 }
 0x203   :  { %v517_v20 = vpop.f32.mrb[1].mxu1 }
 0x204   :  { %v205_v21 = vpop.f32.mrb[2].mxu1 }
 0x205   :  { %v518_v22 = vpop.f32.mrb[3].mxu1 }
 0x20a   :  { %v263_v23 = vpop.f32.mrb[4].mxu1 }
 0x20b   :  { %v264_v24 = vadd.f32 %v263_v23, %v202_v19  ;;  %v525_v25 = vpop.f32.mrb[5].mxu1 }
 0x20c   :  { %v266_v26 = vpop.f32.mrb[6].mxu1 }
 0x20d   :  { %v267_v27 = vadd.f32 %v266_v26, %v205_v21  ;;  %v526_v28 = vpop.f32.mrb[7].mxu1 }
 0x274   :  { %v319_v29 = vpop.f32.mrb[4].mxu0 }
 0x275   :  { %v326_v30 = vadd.f32 %v319_v29, %v264_v24  ;;  %v531_v31 = vpop.f32.mrb[5].mxu0 }
 0x276   :  { %v322_v32 = vpop.f32.mrb[6].mxu0 }
 0x277   :  { %v327_v33 = vadd.f32 %v322_v32, %v267_v27  ;;  %v532_v34 = vpop.f32.mrb[7].mxu0 }
 0x278   :  { %v376_v35 = vpop.f32.mrb[8].mxu1 }
 0x279   :  { %v383_v36 = vadd.f32 %v376_v35, %v326_v30  ;;  %v537_v37 = vpop.f32.mrb[9].mxu1 }
 0x27a   :  { %v379_v38 = vpop.f32.mrb[10].mxu1 }
 0x27b   :  { %v384_v39 = vadd.f32 %v379_v38, %v327_v33  ;;  %v538_v40 = vpop.f32.mrb[11].mxu1 }
 0x27c   :  { %v433_v41 = vpop.f32.mrb[8].mxu0 }
 0x27d   :  { %v440_v43 = vadd.f32 %v433_v41, %v383_v36  ;;  %v543_v44 = vpop.f32.mrb[9].mxu0 }
 0x27e   :  { %v436_v45 = vpop.f32.mrb[10].mxu0 }
 0x27f   :  { %v449_v46 = vadd.f32 %v490_v42, %v440_v43  ;;  %v441_v47 = vadd.f32 %v436_v45, %v384_v39  ;;  %v544_v48 = vpop.f32.mrb[11].mxu0 }
 0x281   :  { %451 = vst.msk [vmem:[#allocation10] sm:$0xff] %vm100_vm1, %v449_v46  ;;  %v450_v49 = vadd.f32 %v490_v42, %v441_v47 }
 0x283   :  { %452 = vst.msk [vmem:[#allocation10 + $0x8] sm:$0xff] %vm100_vm1, %v450_v49 }
 0x284   :  { %667 = shalt.err (!%p664_p8)
}
 0x285   :  { %s668_s22 = scalar_lea.hbm %s838_s5, 256 }
 0x286   :  { %p669_p9 = scmp.ne.s32.totalorder %s838_s5, %s668_s22  ;;  %p672_p10 = scmp.lt.u32.totalorder %s668_s22, %s838_s5 }
 0x288   :  { %p674_p11 = pnand %p672_p10, %p669_p9 }
 0x28a   :  { %677 = shalt.err (!%p674_p11)
}
 0x28b   :  { %s697_s27 = smov 128   ;;  %s698_s28 = smov 8  }
 0x28c   :  { %464 = dma.vmem_to_hbm [thread:$0]  %s459_s18, 256, %s838_s5, [#allocation4], %s697_s27, %s697_s27, %s698_s28  }
 0x28d   :  { %684 = dma.done.wait [#allocation4], 256  }
 0x28e   :  { %685 = vsyncadd [#allocation4], 4294967040 }
 0x28f   :  { %468 = vsyncpa [#allocation3], 1 }
 0x290   :  { %469 = vsyncpa [#allocation6], 1 }
 0x291   :  { %470 = vsyncpa [#allocation9], 1 }
 0x292   :  { %471 = vsyncpa [#allocation4], 1 }

</bundles_post_ra>
